<compile_context>
chip_gen: v7x
topology: tpu7x:2x2x1
jax: 0.10.0
libtpu: 0.0.40
codegen_flags: <defaults>
</compile_context>

<pallas_src>
import math

import jax
import jax.numpy as jnp
from jax.experimental import pallas as pl
from jax.experimental.pallas import tpu as pltpu


def _round_up(n, m):
    return ((n + m - 1) // m) * m


def _mlp_kernel(x_ref, w1_ref, b1_ref, w2_ref, b2_ref, w3_ref, b3_ref, o_ref):
    """One batch tile of the 3-layer value MLP.

    x_ref : (TB, F) bf16   batch on sublanes, features on lanes
    w1    : (F, H)  bf16
    b1,b2 : (1, H)  f32
    w2    : (H, H)  f32
    w3    : (H, 1)  f32    value-head weights as a column
    b3    : (1, 1)  f32
    o_ref : (1, TB) f32    lane-dense output row (batch on lanes)
    """
    # Layer 1: MXU matmul, bf16 operands, f32 accumulation.
    h1 = jnp.dot(x_ref[...], w1_ref[...], preferred_element_type=jnp.float32)
    h1 = jnp.maximum(h1 + b1_ref[...], 0.0)
    # Layer 2: MXU matmul, f32.
    h2 = jnp.dot(h1, w2_ref[...], preferred_element_type=jnp.float32)
    h2 = jnp.maximum(h2 + b2_ref[...], 0.0)
    # Value head (H -> 1): off the MXU.  Transpose once (XLU slot, otherwise
    # idle), then VPU multiply + cross-sublane reduce gives a lane-dense
    # (1, TB) row so the final store is an unmasked, full-lane store.
    h2t = h2.T                                               # (H, TB)
    out = jnp.sum(h2t * w3_ref[...], axis=0, keepdims=True) + b3_ref[...]
    o_ref[...] = out.astype(o_ref.dtype)


def baseline_evaluate(x, params, *, block_rows=1024, compute_dtype=jnp.bfloat16):
    """x: [B, num_inputs] float32. Returns [B, 1] float32."""
    w1, b1, w2, b2, w3, b3 = params
    B, F = x.shape
    H = w1.shape[1]

    tb = min(block_rows, _round_up(B, 128))     # batch tile, multiple of 128
    b_pad = _round_up(B, tb)
    num_tiles = b_pad // tb

    # x is the only streamed array: cast to bf16 (halves HBM bytes).  Weights
    # are tiny and VMEM-resident, so w2/w3/biases stay f32 for accuracy.
    x_p = jnp.pad(x.astype(compute_dtype), ((0, b_pad - B), (0, 0)))
    w1_c = w1.astype(compute_dtype)
    w2_c = w2.astype(jnp.float32)
    b1_r = jnp.reshape(b1, (1, H)).astype(jnp.float32)
    b2_r = jnp.reshape(b2, (1, H)).astype(jnp.float32)
    w3_c = jnp.reshape(w3, (H, 1)).astype(jnp.float32)
    b3_r = jnp.reshape(b3, (1, 1)).astype(jnp.float32)

    itemsize = jnp.dtype(compute_dtype).itemsize
    flops = 2 * b_pad * (F * H + H * H + H)
    bytes_accessed = (b_pad * F * itemsize            # streamed activations
                      + F * H * itemsize + H * H * 4  # resident weights
                      + (3 * H + 1) * 4               # biases + value head
                      + b_pad * 4)                    # output row

    out_row = pl.pallas_call(
        _mlp_kernel,
        out_shape=jax.ShapeDtypeStruct((1, b_pad), jnp.float32),
        grid=(num_tiles,),
        in_specs=[
            pl.BlockSpec((tb, F), lambda i: (i, 0)),   # x: one tile per step
            pl.BlockSpec((F, H), lambda i: (0, 0)),    # w1 (VMEM-resident)
            pl.BlockSpec((1, H), lambda i: (0, 0)),    # b1
            pl.BlockSpec((H, H), lambda i: (0, 0)),    # w2
            pl.BlockSpec((1, H), lambda i: (0, 0)),    # b2
            pl.BlockSpec((H, 1), lambda i: (0, 0)),    # w3
            pl.BlockSpec((1, 1), lambda i: (0, 0)),    # b3
        ],
        out_specs=pl.BlockSpec((1, tb), lambda i: (0, i)),   # lane-dense row
        compiler_params=pltpu.CompilerParams(
            dimension_semantics=("parallel",)),        # 2 TCs on v7x
        cost_estimate=pl.CostEstimate(
            flops=flops, transcendentals=0, bytes_accessed=bytes_accessed),
    )(x_p, w1_c, b1_r, w2_c, b2_r, w3_c, b3_r)

    return out_row[0, :B][:, None]


def orthogonal_init(key, shape, gain):
    """Orthogonal init following torch.nn.init.orthogonal_'s algorithm
    (QR of a (max, min) Gaussian, sign-corrected by diag(R))."""
    rows, cols = shape
    a = jax.random.normal(key, (max(rows, cols), min(rows, cols)), jnp.float32)
    q, r = jnp.linalg.qr(a)
    d = jnp.diagonal(r)
    q = q * jnp.where(d >= 0.0, 1.0, -1.0)   # sign fix; never zeros a column
    if rows < cols:
        q = q.T
    return gain * q


def init_params(key, num_inputs, hidden_size=64, num_outputs=1):
    gain = math.sqrt(2.0)
    k1, k2, k3 = jax.random.split(key, 3)
    # torch Linear weight is [out, in]; we store [in, out] for row-major matmul.
    w1 = orthogonal_init(k1, (num_inputs, hidden_size), gain)
    b1 = jnp.zeros((1, hidden_size), jnp.float32)
    w2 = orthogonal_init(k2, (hidden_size, hidden_size), gain)
    b2 = jnp.zeros((1, hidden_size), jnp.float32)
    w3 = orthogonal_init(k3, (hidden_size, num_outputs), gain)
    b3 = jnp.zeros((1, num_outputs), jnp.float32)
    return (w1, b1, w2, b2, w3, b3)


if __name__ == "__main__":
    # Baseline(__init__): num_inputs = action_space.n + obs_shape[0] * 2
    # Small deterministic sizes: obs_shape[0]=4, Discrete(6) -> num_inputs=14
    obs_dim = 4
    action_n = 6
    num_inputs = action_n + obs_dim * 2  # 14
    hidden_size = 64
    batch = 8

    key = jax.random.PRNGKey(0)
    k_params, k_x = jax.random.split(key)
    params = init_params(k_params, num_inputs, hidden_size, num_outputs=1)
    x = jax.random.normal(k_x, (batch, num_inputs), dtype=jnp.float32)

    out = baseline_evaluate(x, params)
    out = jax.block_until_ready(out)

    w1, b1, w2, b2, w3, b3 = params
    # Reference matching the kernel's mixed precision (x, w1 cast to bf16).
    xe = x.astype(jnp.bfloat16).astype(jnp.float32)
    w1e = w1.astype(jnp.bfloat16).astype(jnp.float32)
    h1 = jnp.maximum(xe @ w1e + b1, 0.0)
    h2 = jnp.maximum(h1 @ w2 + b2, 0.0)
    ref_mixed = h2 @ w3 + b3
    # Full-float32 reference (original module semantics).
    h1f = jnp.maximum(x @ w1 + b1, 0.0)
    h2f = jnp.maximum(h1f @ w2 + b2, 0.0)
    ref_f32 = h2f @ w3 + b3

    assert out.shape == (batch, 1)
    assert jnp.allclose(out, ref_mixed, atol=2e-3, rtol=2e-3)
    assert jnp.allclose(out, ref_f32, atol=1e-1, rtol=1e-1)

    print("KERNEL_OK")
</pallas_src>

<mosaic_0001>
module attributes {stable_mosaic.version = 11 : i64} {
  func.func @_mlp_kernel(%arg0: i32, %arg1: memref<128x14xbf16, #tpu.memory_space<vmem>>, %arg2: memref<14x64xbf16, #tpu.memory_space<vmem>>, %arg3: memref<1x64xf32, #tpu.memory_space<vmem>>, %arg4: memref<64x64xf32, #tpu.memory_space<vmem>>, %arg5: memref<1x64xf32, #tpu.memory_space<vmem>>, %arg6: memref<64x1xf32, #tpu.memory_space<vmem>>, %arg7: memref<1x1xf32, #tpu.memory_space<vmem>>, %arg8: memref<1x128xf32, #tpu.memory_space<vmem>>) attributes {dimension_semantics = [#tpu.dimension_semantics<parallel>], iteration_bounds = array<i64: 1>, scalar_prefetch = 0 : i64, scratch_operands = 0 : i64, tpu.core_type = #tpu.core_type<tc>, window_params = [{transform_indices = @transform_0, window_bounds = array<i64: 128, 14>}, {pipeline_mode = #tpu.pipeline_mode<synchronous>, transform_indices = @transform_1, window_bounds = array<i64: 14, 64>}, {pipeline_mode = #tpu.pipeline_mode<synchronous>, transform_indices = @transform_2, window_bounds = array<i64: 1, 64>}, {pipeline_mode = #tpu.pipeline_mode<synchronous>, transform_indices = @transform_3, window_bounds = array<i64: 64, 64>}, {pipeline_mode = #tpu.pipeline_mode<synchronous>, transform_indices = @transform_4, window_bounds = array<i64: 1, 64>}, {pipeline_mode = #tpu.pipeline_mode<synchronous>, transform_indices = @transform_5, window_bounds = array<i64: 64, 1>}, {pipeline_mode = #tpu.pipeline_mode<synchronous>, transform_indices = @transform_6, window_bounds = array<i64: 1, 1>}, {transform_indices = @transform_7, window_bounds = array<i64: 1, 128>}]} {
    %c0 = arith.constant 0 : index
    %c0_0 = arith.constant 0 : index
    %0 = vector.load %arg1[%c0, %c0_0] : memref<128x14xbf16, #tpu.memory_space<vmem>>, vector<128x14xbf16>
    %c0_1 = arith.constant 0 : index
    %c0_2 = arith.constant 0 : index
    %1 = vector.load %arg2[%c0_1, %c0_2] : memref<14x64xbf16, #tpu.memory_space<vmem>>, vector<14x64xbf16>
    %cst = arith.constant dense<0.000000e+00> : vector<128x64xf32>
    %2 = tpu.matmul %0, %1, %cst {dimension_numbers = #tpu.dot_dimension_numbers<[1], [0], [0], [1], [0, 0, 1, 1], [], []>} : vector<128x14xbf16>, vector<14x64xbf16>, vector<128x64xf32> -> vector<128x64xf32>
    %c0_3 = arith.constant 0 : index
    %c0_4 = arith.constant 0 : index
    %3 = vector.load %arg3[%c0_3, %c0_4] : memref<1x64xf32, #tpu.memory_space<vmem>>, vector<1x64xf32>
    %4 = vector.broadcast %3 : vector<1x64xf32> to vector<128x64xf32>
    %5 = arith.addf %2, %4 : vector<128x64xf32>
    %cst_5 = arith.constant 0.000000e+00 : f32
    %6 = vector.broadcast %cst_5 : f32 to vector<128x64xf32>
    %7 = arith.maximumf %5, %6 : vector<128x64xf32>
    %c0_6 = arith.constant 0 : index
    %c0_7 = arith.constant 0 : index
    %8 = vector.load %arg4[%c0_6, %c0_7] : memref<64x64xf32, #tpu.memory_space<vmem>>, vector<64x64xf32>
    %cst_8 = arith.constant dense<0.000000e+00> : vector<128x64xf32>
    %9 = tpu.matmul %7, %8, %cst_8 {dimension_numbers = #tpu.dot_dimension_numbers<[1], [0], [0], [1], [0, 0, 1, 1], [], []>} : vector<128x64xf32>, vector<64x64xf32>, vector<128x64xf32> -> vector<128x64xf32>
    %c0_9 = arith.constant 0 : index
    %c0_10 = arith.constant 0 : index
    %10 = vector.load %arg5[%c0_9, %c0_10] : memref<1x64xf32, #tpu.memory_space<vmem>>, vector<1x64xf32>
    %11 = vector.broadcast %10 : vector<1x64xf32> to vector<128x64xf32>
    %12 = arith.addf %9, %11 : vector<128x64xf32>
    %cst_11 = arith.constant 0.000000e+00 : f32
    %13 = vector.broadcast %cst_11 : f32 to vector<128x64xf32>
    %14 = arith.maximumf %12, %13 : vector<128x64xf32>
    %15 = tpu.transpose %14, [1, 0] : vector<128x64xf32> -> vector<64x128xf32>
    %c0_12 = arith.constant 0 : index
    %c0_13 = arith.constant 0 : index
    %16 = vector.load %arg6[%c0_12, %c0_13] : memref<64x1xf32, #tpu.memory_space<vmem>>, vector<64x1xf32>
    %17 = vector.broadcast %16 : vector<64x1xf32> to vector<64x128xf32>
    %18 = arith.mulf %15, %17 : vector<64x128xf32>
    %cst_14 = arith.constant dense<0.000000e+00> : vector<128xf32>
    %19 = vector.multi_reduction <add>, %18, %cst_14 [0] : vector<64x128xf32> to vector<128xf32>
    %20 = vector.shape_cast %19 : vector<128xf32> to vector<1x128xf32>
    %c0_15 = arith.constant 0 : index
    %c0_16 = arith.constant 0 : index
    %21 = vector.load %arg7[%c0_15, %c0_16] : memref<1x1xf32, #tpu.memory_space<vmem>>, vector<1x1xf32>
    %22 = vector.broadcast %21 : vector<1x1xf32> to vector<1x128xf32>
    %23 = arith.addf %20, %22 : vector<1x128xf32>
    %c0_17 = arith.constant 0 : index
    %c0_18 = arith.constant 0 : index
    %24 = vector.load %arg8[%c0_17, %c0_18] : memref<1x128xf32, #tpu.memory_space<vmem>>, vector<1x128xf32>
    tpu.vector_store %arg8[%c0_17, %c0_18], %23 {strides = array<i32>} : memref<1x128xf32, #tpu.memory_space<vmem>>, vector<1x128xf32>,
    return
  }
  func.func @transform_0(%arg0: i32) -> (i32, i32) {
    %c0_i32 = arith.constant 0 : i32
    %c0_i32_0 = arith.constant 0 : i32
    return %arg0, %c0_i32 : i32, i32
  }
  func.func @transform_1(%arg0: i32) -> (i32, i32) {
    %c0_i32 = arith.constant 0 : i32
    %c0_i32_0 = arith.constant 0 : i32
    %c0_i32_1 = arith.constant 0 : i32
    return %c0_i32, %c0_i32_0 : i32, i32
  }
  func.func @transform_2(%arg0: i32) -> (i32, i32) {
    %c0_i32 = arith.constant 0 : i32
    %c0_i32_0 = arith.constant 0 : i32
    %c0_i32_1 = arith.constant 0 : i32
    return %c0_i32, %c0_i32_0 : i32, i32
  }
  func.func @transform_3(%arg0: i32) -> (i32, i32) {
    %c0_i32 = arith.constant 0 : i32
    %c0_i32_0 = arith.constant 0 : i32
    %c0_i32_1 = arith.constant 0 : i32
    return %c0_i32, %c0_i32_0 : i32, i32
  }
  func.func @transform_4(%arg0: i32) -> (i32, i32) {
    %c0_i32 = arith.constant 0 : i32
    %c0_i32_0 = arith.constant 0 : i32
    %c0_i32_1 = arith.constant 0 : i32
    return %c0_i32, %c0_i32_0 : i32, i32
  }
  func.func @transform_5(%arg0: i32) -> (i32, i32) {
    %c0_i32 = arith.constant 0 : i32
    %c0_i32_0 = arith.constant 0 : i32
    %c0_i32_1 = arith.constant 0 : i32
    return %c0_i32, %c0_i32_0 : i32, i32
  }
  func.func @transform_6(%arg0: i32) -> (i32, i32) {
    %c0_i32 = arith.constant 0 : i32
    %c0_i32_0 = arith.constant 0 : i32
    %c0_i32_1 = arith.constant 0 : i32
    return %c0_i32, %c0_i32_0 : i32, i32
  }
  func.func @transform_7(%arg0: i32) -> (i32, i32) {
    %c0_i32 = arith.constant 0 : i32
    %c0_i32_0 = arith.constant 0 : i32
    return %c0_i32, %arg0 : i32, i32
  }
}

</mosaic_0001>

<bundles_post_ra>
// kernel: tpu_custom_call.1
= control target key start
LH: loop header
LB: loop body
LE: loop exit
PB: predicated region body
PF: predicated region fallthrough
CT: control target
= control target key end

     0   :  { %s944_s0 = inlined_call_operand.vmem [shape: bf16[128,14], index: 0, kind: input, shape index: {}]   ;;  %s945_s1 = inlined_call_operand.vmem [shape: bf16[14,64], index: 1, kind: input, shape index: {}]   ;;  %s946_s2 = inlined_call_operand.vmem [shape: f32[1,64], index: 2, kind: input, shape index: {}]   ;;  %s947_s3 = inlined_call_operand.vmem [shape: f32[64,64], index: 3, kind: input, shape index: {}]   ;;  %s948_s4 = inlined_call_operand.vmem [shape: f32[1,64], index: 4, kind: input, shape index: {}]   ;;  %s949_s5 = inlined_call_operand.vmem [shape: f32[64,1], index: 5, kind: input, shape index: {}]   ;;  %s950_s6 = inlined_call_operand.<no memory space> [shape: f32[1,1], index: 6, kind: input, shape index: {}]   ;;  %s951_s7 = inlined_call_operand.hbm [shape: f32[1,128], index: 7, kind: output, shape index: {}]  }
   0x1   :  { %v12_v0 = vstv %s950_s6 }
   0x2   :  { %13 = vst [vmem:[#allocation2] sm:$0x1] %v12_v0 }
   0x3   :  { %v749_v1 = vld [vmem:[%s945_s1] sm:$0x7f]   ;;  %vm125_vm0 = vcmask 1046528   ;;  %vm100_vm1 = vcmask 113664   ;;  %v751_v4 = vld [vmem:[%s944_s0 + $0x8] sm:$0xff]   ;;  %v752_v5 = vld [vmem:[%s944_s0 + $0x10] sm:$0xff]  }
   0x4   :  { %v750_v2 = vld [vmem:[%s944_s0] sm:$0xff]   ;;  %744 = vmatprep.subr.msk.bf16.mxu0 %vm125_vm0, %v749_v1  ;;  %v127_v3 = vsel %vm125_vm0, %v749_v1, 0  ;;  %v243_v7 = vld [vmem:[%s947_s3 + $0x8] sm:$0xff]  ;;  %v753_v8 = vld [vmem:[%s944_s0 + $0x18] sm:$0xff]  }
   0x5   :  { %663 = vmatpush3.bf16.msra.mxu0 %v127_v3  ;;  %664 = vmatprep.mubr.msk.bf16.mxu0 %vm100_vm1, %v750_v2  ;;  %v242_v6 = vld [vmem:[%s947_s3] sm:$0xff]  ;;  %v244_v10 = vld [vmem:[%s947_s3 + $0x10] sm:$0xff]  ;;  %v245_v11 = vld [vmem:[%s947_s3 + $0x18] sm:$0xff] }
   0x6   :  { %v720_v9 = vpack.c.bf16 %v243_v7, %v242_v6  ;;  %v754_v12 = vld [vmem:[%s944_s0 + $0x20] sm:$0xff]   ;;  %v724_v13 = vpack.c.bf16 %v245_v11, %v244_v10  ;;  %v247_v15 = vld [vmem:[%s947_s3 + $0x28] sm:$0xff] }
   0x7   :  { %v246_v14 = vld [vmem:[%s947_s3 + $0x20] sm:$0xff] }
   0x8   :  { %665 = vmatmul.mubr.msk.bf16.vlgmr.msra.gmra.mrb[0].mxu0 %vm100_vm1, %v751_v4  ;;  %721 = vmatprep.subr.bf16.mxu0 %v720_v9 }
   0x9   :  { %668 = vmatprep.mubr.msk.bf16.mxu0 %vm100_vm1, %v752_v5  ;;  %736 = vmatprep.subr.bf16.mxu1 %v720_v9 }
   0xa   :  { %14 = vsyncpa [#allocation4], 0  ;;  %723 = vmatpush3.bf16.msra.mxu0 %v720_v9  ;;  %740 = vmatpush3.bf16.msra.mxu1 %v720_v9  ;;  %v728_v16 = vpack.c.bf16 %v247_v15, %v246_v14  ;;  %v248_v17 = vld [vmem:[%s947_s3 + $0x30] sm:$0xff]  ;;  %v249_v18 = vld [vmem:[%s947_s3 + $0x38] sm:$0xff]  ;;  %v782_v24 = vmov 0   ;;  %vm257_vm2 = vcmask 523264  }
   0xb   :  { %725 = vmatprep.subr.bf16.mxu0 %v724_v13  ;;  %737 = vmatprep.subr.bf16.mxu1 %v724_v13  ;;  %v755_v19 = vld [vmem:[%s944_s0 + $0x28] sm:$0xff]   ;;  %v732_v20 = vpack.c.bf16 %v249_v18, %v248_v17  ;;  %v756_v21 = vld [vmem:[%s944_s0 + $0x30] sm:$0xff]   ;;  %v757_v22 = vld [vmem:[%s944_s0 + $0x38] sm:$0xff]  }
   0xc   :  { %v501_v23 = vld [vmem:[%s949_s5 + $0x10] sm:$0xff]  ;;  %748 = vset.pattern.permute.xlu1 %v782_v24  ;;  %747 = vset.pattern.permute.xlu0 %v782_v24  ;;  %v502_v25 = vld [vmem:[%s949_s5 + $0x18] sm:$0xff]  ;;  %v504_v26 = vld [vmem:[%s949_s5 + $0x28] sm:$0xff] }
   0xd   :  { %519 = vperm.xlu1 %748, %v501_v23   ;;  %v506_v27 = vld [vmem:[%s949_s5 + $0x38] sm:$0xff]  ;;  %v594_v28 = vld [vmem:[%s946_s2] ss:$0 sm:$0xff]  ;;  %v500_v14 = vld [vmem:[%s949_s5 + $0x8] sm:$0xff] }
   0xe   :  { %727 = vmatpush3.bf16.msra.mxu0 %v724_v13  ;;  %741 = vmatpush3.bf16.msra.mxu1 %v724_v13  ;;  %v499_v13 = vld [vmem:[%s949_s5] sm:$0xff] }
   0xf   :  { %729 = vmatprep.subr.bf16.mxu0 %v728_v16  ;;  %738 = vmatprep.subr.bf16.mxu1 %v728_v16  ;;  %v503_v15 = vld [vmem:[%s949_s5 + $0x20] sm:$0xff] }
  0x10   :  { %669 = vmatmul.mubr.msk.bf16.gmra.mrb[4].mxu0 %vm100_vm1, %v753_v8  ;;  %509 = vperm.xlu0 %747, %v499_v13   ;;  %v568_v17 = vld [vmem:[#allocation2] sm:$0x1] }
  0x11   :  { %672 = vmatprep.mubr.msk.bf16.mxu0 %vm100_vm1, %v754_v12  ;;  %524 = vperm.xlu1 %748, %v502_v25  }
  0x12   :  { %731 = vmatpush3.bf16.msra.mxu0 %v728_v16  ;;  %742 = vmatpush3.bf16.msra.mxu1 %v728_v16  ;;  %v505_v16 = vld [vmem:[%s949_s5 + $0x30] sm:$0xff] }
  0x13   :  { %733 = vmatprep.subr.bf16.mxu0 %v732_v20  ;;  %739 = vmatprep.subr.bf16.mxu1 %v732_v20 }
  0x14   :  { %514 = vperm.xlu0 %747, %v500_v14  }
  0x15   :  { %534 = vperm.xlu1 %748, %v504_v26  }
  0x16   :  { %735 = vmatpush3.bf16.msra.mxu0 %v732_v20  ;;  %743 = vmatpush3.bf16.msra.mxu1 %v732_v20 }
  0x18   :  { %673 = vmatmul.mubr.msk.bf16.gmra.mrb[8].mxu0 %vm100_vm1, %v755_v19  ;;  %529 = vperm.xlu0 %747, %v503_v15  }
  0x19   :  { %676 = vmatprep.mubr.msk.bf16.mxu0 %vm100_vm1, %v756_v21  ;;  %544 = vperm.xlu1 %748, %v506_v27   ;;  %v612_v21 = vld [vmem:[%s948_s4] ss:$0 sm:$0xff]  ;;  %s783_s4 = smov [#allocation3]  }
  0x1a   :  { %s586_s5 = sshll.u32 %s783_s4, 4  ;;  %s587_s5 = int_to_ptr.vmem [resolvable:$true] %s586_s5 }
  0x1b   :  { %s758_s27 = scalar_lea.vmem %s587_s5, 16  ;;  %s762_s28 = scalar_lea.vmem %s587_s5, 32 }
  0x1c   :  { %539 = vperm.xlu0 %747, %v505_v16   ;;  %p759_p0 = scmp.ne.s32.totalorder %s587_s5, %s758_s27  ;;  %p763_p1 = scmp.lt.s32.totalorder %s587_s5, %s587_s5 }
  0x1d   :  { %p764_p2 = scmp.lt.s32.totalorder %s762_s28, %s758_s27 }
  0x1f   :  { %p765_p3 = por %p764_p2, %p763_p1 }
  0x20   :  { %677 = vmatmul.mubr.msk.bf16.gmra.mrb[12].mxu0 %vm100_vm1, %v757_v22  ;;  %571 = vperm.xlu0 %747, %v568_v17  }
  0x21   :  { %p766_p4 = pnand %p765_p3, %p759_p0 }
  0xdb   :  { %v666_v29 = vpop.f32.mrb[0].mxu0 }
  0xdc   :  { %v172_v30 = vadd.f32 %v666_v29, %v594_v28  ;;  %v163_v31 = vpop.f32.mrb[1].mxu0 }
  0xdd   :  { %v164_v32 = vadd.f32 %v594_v28, %v163_v31  ;;  %v667_v33 = vpop.f32.mrb[2].mxu0 }
  0xde   :  { %v228_v34 = vmax.f32 %v172_v30, 0.0  ;;  %v175_v35 = vadd.f32 %v667_v33, %v594_v28  ;;  %v166_v36 = vpop.f32.mrb[3].mxu0 }
  0xdf   :  { %v226_v37 = vmax.f32 %v164_v32, 0.0  ;;  %v167_v38 = vadd.f32 %v594_v28, %v166_v36 }
  0xe0   :  { %v229_v39 = vmax.f32 %v175_v35, 0.0  ;;  %699 = vmatprep.mubr.msk.f32.mxu1 %vm257_vm2, %v228_v34 }
  0xe1   :  { %v227_v40 = vmax.f32 %v167_v38, 0.0  ;;  %696 = vmatprep.mubr.msk.f32.mxu0 %vm257_vm2, %v226_v37 }
  0xe2   :  { %700 = vmatmul.mubr.msk.f32.vlgmr.msra.gmra.mrb[0].mxu1 %vm257_vm2, %v229_v39 }
  0xe3   :  { %v670_v41 = vpop.f32.mrb[4].mxu0  ;;  %697 = vmatmul.mubr.msk.f32.vlgmr.msra.gmra.mrb[16].mxu0 %vm257_vm2, %v227_v40 }
  0xe4   :  { %v188_v42 = vadd.f32 %v670_v41, %v594_v28  ;;  %v179_v43 = vpop.f32.mrb[5].mxu0 }
  0xe5   :  { %v180_v44 = vadd.f32 %v594_v28, %v179_v43  ;;  %v671_v45 = vpop.f32.mrb[6].mxu0 }
  0xe6   :  { %v182_v46 = vpop.f32.mrb[7].mxu0  ;;  %v191_v48 = vadd.f32 %v671_v45, %v594_v28  ;;  %v232_v50 = vmax.f32 %v188_v42, 0.0 }
  0xe7   :  { %v230_v47 = vmax.f32 %v180_v44, 0.0  ;;  %v183_v49 = vadd.f32 %v594_v28, %v182_v46 }
  0xe8   :  { %v233_v52 = vmax.f32 %v191_v48, 0.0 }
  0xe9   :  { %v231_v51 = vmax.f32 %v183_v49, 0.0  ;;  %702 = vmatprep.mubr.msk.f32.mxu1 %vm257_vm2, %v230_v47 }
  0xeb   :  { %703 = vmatmul.mubr.msk.f32.gmra.mrb[2].mxu1 %vm257_vm2, %v231_v51  ;;  %v674_v53 = vpop.f32.mrb[8].mxu0 }
  0xec   :  { %705 = vmatprep.mubr.msk.f32.mxu1 %vm257_vm2, %v232_v50  ;;  %v204_v54 = vadd.f32 %v674_v53, %v594_v28  ;;  %v195_v55 = vpop.f32.mrb[9].mxu0 }
  0xed   :  { %v196_v56 = vadd.f32 %v594_v28, %v195_v55  ;;  %v675_v57 = vpop.f32.mrb[10].mxu0 }
  0xee   :  { %v198_v58 = vpop.f32.mrb[11].mxu0  ;;  %v207_v60 = vadd.f32 %v675_v57, %v594_v28  ;;  %v236_v62 = vmax.f32 %v204_v54, 0.0 }
  0xef   :  { %706 = vmatmul.mubr.msk.f32.gmra.mrb[4].mxu1 %vm257_vm2, %v233_v52  ;;  %v234_v59 = vmax.f32 %v196_v56, 0.0  ;;  %v199_v61 = vadd.f32 %v594_v28, %v198_v58 }
  0xf0   :  { %v237_v0 = vmax.f32 %v207_v60, 0.0 }
  0xf1   :  { %v235_v63 = vmax.f32 %v199_v61, 0.0  ;;  %708 = vmatprep.mubr.msk.f32.mxu1 %vm257_vm2, %v234_v59 }
  0xf3   :  { %709 = vmatmul.mubr.msk.f32.gmra.mrb[6].mxu1 %vm257_vm2, %v235_v63  ;;  %v678_v1 = vpop.f32.mrb[12].mxu0 }
  0xf4   :  { %711 = vmatprep.mubr.msk.f32.mxu1 %vm257_vm2, %v236_v62  ;;  %v220_v2 = vadd.f32 %v678_v1, %v594_v28  ;;  %v211_v3 = vpop.f32.mrb[13].mxu0 }
  0xf5   :  { %v212_v4 = vadd.f32 %v594_v28, %v211_v3  ;;  %v679_v5 = vpop.f32.mrb[14].mxu0  ;;  %v520_v3 = vpop.permute.xlu1 %519 }
  0xf6   :  { %v214_v6 = vpop.f32.mrb[15].mxu0  ;;  %v223_v8 = vadd.f32 %v679_v5, %v594_v28  ;;  %v240_v10 = vmax.f32 %v220_v2, 0.0 }
  0xf7   :  { %712 = vmatmul.mubr.msk.f32.gmra.mrb[8].mxu1 %vm257_vm2, %v237_v0  ;;  %v238_v7 = vmax.f32 %v212_v4, 0.0  ;;  %v215_v9 = vadd.f32 %v594_v28, %v214_v6 }
  0xf8   :  { %v241_v12 = vmax.f32 %v223_v8, 0.0 }
  0xf9   :  { %v239_v11 = vmax.f32 %v215_v9, 0.0  ;;  %714 = vmatprep.mubr.msk.f32.mxu1 %vm257_vm2, %v238_v7  ;;  %v525_v4 = vpop.permute.xlu1 %524  ;;  %v510_v9 = vpop.permute.xlu0 %509 }
  0xfb   :  { %715 = vmatmul.mubr.msk.f32.gmra.mrb[10].mxu1 %vm257_vm2, %v239_v11 }
  0xfc   :  { %717 = vmatprep.mubr.msk.f32.mxu1 %vm257_vm2, %v240_v10 }
  0xfd   :  { %v535_v5 = vpop.permute.xlu1 %534  ;;  %v515_v11 = vpop.permute.xlu0 %514 }
  0xff   :  { %718 = vmatmul.mubr.msk.f32.gmra.mrb[12].mxu1 %vm257_vm2, %v241_v12 }
 0x101   :  { %v545_v6 = vpop.permute.xlu1 %544  ;;  %v530_v17 = vpop.permute.xlu0 %529 }
 0x1b5   :  { %v701_v18 = vpop.f32.mrb[0].mxu1 }
 0x1b6   :  { %v698_v19 = vpop.f32.mrb[16].mxu0  ;;  %v382_v20 = vpop.f32.mrb[1].mxu1  ;;  %v388_v30 = vadd.f32 %v701_v18, %v612_v21 }
 0x1b7   :  { %v372_v22 = vpop.f32.mrb[17].mxu0  ;;  %v378_v24 = vadd.f32 %v698_v19, %v612_v21  ;;  %v383_v27 = vadd.f32 %v612_v21, %v382_v20 }
 0x1b8   :  { %v373_v23 = vadd.f32 %v612_v21, %v372_v22  ;;  %v454_v34 = vmax.f32 %v388_v30, 0.0 }
 0x1b9   :  { %v452_v26 = vmax.f32 %v378_v24, 0.0  ;;  %v453_v31 = vmax.f32 %v383_v27, 0.0 }
 0x1ba   :  { %v451_v25 = vmax.f32 %v373_v23, 0.0 }
 0x1bc   :  { %467 = vxpose.xlu1.b32.start [1/16] (narrow) %v451_v25, 64  ;;  %v540_v25 = vpop.permute.xlu0 %539 }
 0x1be   :  { %v704_v28 = vpop.f32.mrb[2].mxu1 }
 0x1bf   :  { %v392_v29 = vpop.f32.mrb[3].mxu1  ;;  %v398_v38 = vadd.f32 %v704_v28, %v612_v21 }
 0x1c0   :  { %468 = vxpose.xlu1.b32.cont [2/16] (narrow) %v452_v26, 64  ;;  %v393_v35 = vadd.f32 %v612_v21, %v392_v29 }
 0x1c1   :  { %v456_v42 = vmax.f32 %v398_v38, 0.0 }
 0x1c2   :  { %v707_v32 = vpop.f32.mrb[4].mxu1  ;;  %v455_v39 = vmax.f32 %v393_v35, 0.0 }
 0x1c3   :  { %v402_v33 = vpop.f32.mrb[5].mxu1  ;;  %v408_v46 = vadd.f32 %v707_v32, %v612_v21 }
 0x1c4   :  { %469 = vxpose.xlu1.b32.cont [3/16] (narrow) %v453_v31, 64  ;;  %v403_v43 = vadd.f32 %v612_v21, %v402_v33  ;;  %v574_v33 = vlaneseq }
 0x1c5   :  { %v458_v50 = vmax.f32 %v408_v46, 0.0 }
 0x1c6   :  { %v710_v36 = vpop.f32.mrb[6].mxu1  ;;  %v457_v47 = vmax.f32 %v403_v43, 0.0 }
 0x1c7   :  { %v412_v37 = vpop.f32.mrb[7].mxu1  ;;  %v418_v52 = vadd.f32 %v710_v36, %v612_v21  ;;  %v575_v36 = vshrl.u32 %v574_v33, 7 }
 0x1c8   :  { %470 = vxpose.xlu1.b32.cont [4/16] (narrow) %v454_v34, 64  ;;  %v413_v51 = vadd.f32 %v612_v21, %v412_v37 }
 0x1c9   :  { %v460_v54 = vmax.f32 %v418_v52, 0.0 }
 0x1ca   :  { %v713_v40 = vpop.f32.mrb[8].mxu1  ;;  %v459_v53 = vmax.f32 %v413_v51, 0.0 }
 0x1cb   :  { %v422_v41 = vpop.f32.mrb[9].mxu1  ;;  %v428_v56 = vadd.f32 %v713_v40, %v612_v21 }
 0x1cc   :  { %471 = vxpose.xlu1.b32.cont [5/16] (narrow) %v455_v39, 64  ;;  %v423_v55 = vadd.f32 %v612_v21, %v422_v41  ;;  %v576_v39 = vsub.s32 0, %v575_v36  ;;  %v572_v41 = vpop.permute.xlu0 %571 }
 0x1cd   :  { %v462_v58 = vmax.f32 %v428_v56, 0.0 }
 0x1ce   :  { %v716_v44 = vpop.f32.mrb[10].mxu1  ;;  %v461_v57 = vmax.f32 %v423_v55, 0.0  ;;  %v577_v43 = vrot.slane %v572_v41, %v576_v39 }
 0x1cf   :  { %v432_v45 = vpop.f32.mrb[11].mxu1  ;;  %v438_v60 = vadd.f32 %v716_v44, %v612_v21 }
 0x1d0   :  { %472 = vxpose.xlu1.b32.cont [6/16] (narrow) %v456_v42, 64  ;;  %v433_v59 = vadd.f32 %v612_v21, %v432_v45 }
 0x1d1   :  { %v464_v62 = vmax.f32 %v438_v60, 0.0 }
 0x1d2   :  { %v719_v48 = vpop.f32.mrb[12].mxu1  ;;  %v463_v61 = vmax.f32 %v433_v59, 0.0 }
 0x1d3   :  { %v442_v49 = vpop.f32.mrb[13].mxu1  ;;  %v448_v0 = vadd.f32 %v719_v48, %v612_v21 }
 0x1d4   :  { %473 = vxpose.xlu1.b32.cont [7/16] (narrow) %v457_v47, 64  ;;  %v443_v63 = vadd.f32 %v612_v21, %v442_v49 }
 0x1d5   :  { %v466_v2 = vmax.f32 %v448_v0, 0.0 }
 0x1d6   :  { %v465_v1 = vmax.f32 %v443_v63, 0.0 }
 0x1d8   :  { %474 = vxpose.xlu1.b32.cont [8/16] (narrow) %v458_v50, 64 }
 0x1dc   :  { %475 = vxpose.xlu1.b32.cont [9/16] (narrow) %v459_v53, 64 }
 0x1e0   :  { %476 = vxpose.xlu1.b32.cont [10/16] (narrow) %v460_v54, 64 }
 0x1e4   :  { %477 = vxpose.xlu1.b32.cont [11/16] (narrow) %v461_v57, 64 }
 0x1e8   :  { %478 = vxpose.xlu1.b32.cont [12/16] (narrow) %v462_v58, 64 }
 0x1ec   :  { %479 = vxpose.xlu1.b32.cont [13/16] (narrow) %v463_v61, 64 }
 0x1f0   :  { %480 = vxpose.xlu1.b32.cont [14/16] (narrow) %v464_v62, 64 }
 0x1f4   :  { %481 = vxpose.xlu1.b32.cont [15/16] (narrow) %v465_v1, 64 }
 0x1f8   :  { %482 = vxpose.xlu1.b32.end [16/16] (narrow) %v466_v2, 64 }
 0x23c   :  { %v483_v7 = vpop.trf.xlu1 }
 0x23d   :  { %v547_v15 = vmul.f32 %v510_v9, %v483_v7 }
 0x240   :  { %v484_v8 = vpop.trf.xlu1 }
 0x241   :  { %v548_v13 = vmul.f32 %v515_v11, %v484_v8 }
 0x243   :  { %v555_v18 = vadd.f32 %v548_v13, %v547_v15 }
 0x244   :  { %v485_v10 = vpop.trf.xlu1 }
 0x245   :  { %v549_v16 = vmul.f32 %v520_v3, %v485_v10 }
 0x247   :  { %v556_v21 = vadd.f32 %v555_v18, %v549_v16 }
 0x248   :  { %v486_v12 = vpop.trf.xlu1 }
 0x249   :  { %v550_v19 = vmul.f32 %v525_v4, %v486_v12 }
 0x24b   :  { %v557_v23 = vadd.f32 %v556_v21, %v550_v19 }
 0x24c   :  { %v487_v14 = vpop.trf.xlu1 }
 0x24d   :  { %v551_v22 = vmul.f32 %v530_v17, %v487_v14 }
 0x24f   :  { %v558_v27 = vadd.f32 %v557_v23, %v551_v22 }
 0x250   :  { %v488_v20 = vpop.trf.xlu1 }
 0x251   :  { %v552_v24 = vmul.f32 %v535_v5, %v488_v20 }
 0x253   :  { %v559_v29 = vadd.f32 %v558_v27, %v552_v24 }
 0x254   :  { %v489_v26 = vpop.trf.xlu1 }
 0x255   :  { %v553_v28 = vmul.f32 %v540_v25, %v489_v26 }
 0x257   :  { %v560_v31 = vadd.f32 %v559_v29, %v553_v28 }
 0x258   :  { %v490_v30 = vpop.trf.xlu1 }
 0x259   :  { %v554_v32 = vmul.f32 %v545_v6, %v490_v30 }
 0x25b   :  { %v561_v34 = vadd.f32 %v560_v31, %v554_v32 }
 0x25d   :  { %v562_v35 = vrot.slane %v561_v34, 4 }
 0x25f   :  { %v563_v37 = vadd.f32 %v562_v35, %v561_v34 }
 0x261   :  { %v564_v38 = vrot.slane %v563_v37, 2 }
 0x263   :  { %v565_v40 = vadd.f32 %v564_v38, %v563_v37 }
 0x265   :  { %v566_v42 = vrot.slane %v565_v40, 1 }
 0x267   :  { %v567_v44 = vadd.f32 %v566_v42, %v565_v40 }
 0x269   :  { %v578_v45 = vadd.f32 %v577_v43, %v567_v44 }
 0x26b   :  { %579 = vst [vmem:[#allocation3] sm:$0x1] %v578_v45 }
 0x26c   :  { %769 = shalt.err (!%p766_p4)
}
 0x26d   :  { %s770_s8 = scalar_lea.hbm %s951_s7, 16 }
 0x26e   :  { %p771_p5 = scmp.ne.s32.totalorder %s951_s7, %s770_s8  ;;  %p774_p6 = scmp.lt.u32.totalorder %s770_s8, %s951_s7 }
 0x270   :  { %p776_p7 = pnand %p774_p6, %p771_p5 }
 0x272   :  { %779 = shalt.err (!%p776_p7)
}
 0x273   :  { %589 = dma.vmem_to_hbm [thread:$0]  %s587_s5, 16, %s951_s7, [#allocation4]  }
 0x274   :  { %780 = dma.done.wait [#allocation4], 16  }
 0x275   :  { %781 = vsyncadd [#allocation4], 4294967280 }
 0x276   :  { %593 = vsyncpa [#allocation4], 1 }

</bundles_post_ra>
